<compile_context>
chip_gen: v6e
topology: v6e:2x2x1
jax: 0.10.0
libtpu: 0.0.40
codegen_flags: <defaults>
</compile_context>

<pallas_src>
import jax
import jax.numpy as jnp
import numpy as np
from jax import lax
from jax.experimental import pallas as pl
from jax.experimental.pallas import tpu as pltpu

# ---- small, module-consistent sizes (original: hidden_size=256, num_classes=len(id2predicate)) ----
HIDDEN = 32            # hidden_size
NUM_CLASSES = 8        # num_classes
C1 = NUM_CLASSES + 1   # linear out features
B = 2                  # batch
S = 8                  # sequence length
NPAD = 128             # fused (po1 || po2) output lanes, zero-padded to a full 128-lane vreg


def object_model_kernel(k1_ref, k2_ref, t_ref, tc_ref, wtap_ref, bc_ref,
                        w12_ref, b12_ref, out_ref, h_scr):
    """Single grid step: the whole (tiny) problem at once.

    k1_ref/k2_ref : (B,)          i32  SMEM (scalar-prefetched subject head / tail indices)
    t_ref         : (B, S, H)     f32  encoder output (gather source)
    tc_ref        : (B, S, 2H)    f32  t_concat
    wtap_ref      : (3, 4H, H)    f32  conv weight, one (in, out) matrix per tap
    bc_ref        : (1, H)        f32  conv bias
    w12_ref       : (H, NPAD)     f32  [W1^T | W2^T | zero-pad]
    b12_ref       : (1, NPAD)     f32  [b1   | b2   | zero-pad]
    out_ref       : (B, S, NPAD)  f32  fused, lane-padded output
    h_scr         : (B*S, 4H)     f32  VMEM scratch holding the assembled conv input
    """
    Bsz, seq, H = t_ref.shape
    rows = Bsz * seq

    # ---- assemble h = [t_concat | k1g | k2g] directly in the VMEM scratch ----
    # Static Python loop: B is a tiny compile-time constant, so all row offsets
    # stay static (at larger B switch to lax.fori_loop(unroll=True)).
    for b in range(Bsz):
        r0 = b * seq
        # t_concat slab
        h_scr[pl.ds(r0, seq), pl.ds(0, 2 * H)] = tc_ref[b]
        # gather(): direct scalar-indexed row loads (indices clamped -> no OOB reads)
        i1 = jnp.clip(k1_ref[b], 0, seq - 1)
        i2 = jnp.clip(k2_ref[b], 0, seq - 1)
        k1row = t_ref[b, pl.ds(i1, 1), :]                         # (1, H)
        k2row = t_ref[b, pl.ds(i2, 1), :]                         # (1, H)
        h_scr[pl.ds(r0, seq), pl.ds(2 * H, H)] = jnp.broadcast_to(k1row, (seq, H))
        h_scr[pl.ds(r0, seq), pl.ds(3 * H, H)] = jnp.broadcast_to(k2row, (seq, H))

    h = h_scr[...]                                                # (B*S, 4H)

    # Per-batch sequence-boundary masks implement Conv1d padding=1; the roll
    # runs over the flattened (B*S) row axis and the masks zero the rows that
    # would otherwise leak across batch boundaries.
    row = lax.broadcasted_iota(jnp.int32, (rows, 1), 0)
    pos = row % seq
    h_prev = jnp.where(pos == 0, 0.0, pltpu.roll(h, shift=1, axis=0))
    h_next = jnp.where(pos == seq - 1, 0.0, pltpu.roll(h, shift=rows - 1, axis=0))

    # Conv1d(k=3, pad=1) as three accumulated MXU matmuls (same total K), then ReLU.
    acc = jnp.dot(h_prev, wtap_ref[0], preferred_element_type=jnp.float32)
    acc = acc + jnp.dot(h, wtap_ref[1], preferred_element_type=jnp.float32)
    acc = acc + jnp.dot(h_next, wtap_ref[2], preferred_element_type=jnp.float32)
    h_conv = jnp.maximum(acc + bc_ref[...], 0.0)                  # (B*S, H)

    # Fused linear heads; 128-lane zero-padded N -> single unmasked dense store.
    out = jnp.dot(h_conv, w12_ref[...], preferred_element_type=jnp.float32) + b12_ref[...]
    out_ref[...] = out.reshape(out_ref.shape)                     # (B, S, NPAD)


def prepare_params(params):
    """One-time parameter layout prep — keep OUT of the per-call path."""
    H = params["conv_b"].shape[0]
    c1 = params["lin1_b"].shape[0]
    # conv weight (H_out, 4H_in, 3) -> (3, 4H_in, H_out): one (in, out) matrix per tap
    wtap = jnp.transpose(params["conv_w"], (2, 1, 0))
    bc = params["conv_b"].reshape(1, H)
    # Fuse the two linear heads and zero-pad N to a full 128-lane vreg.
    w12 = jnp.concatenate([params["lin1_w"].T, params["lin2_w"].T], axis=1)   # (H, 2*c1)
    b12 = jnp.concatenate([params["lin1_b"], params["lin2_b"]]).reshape(1, -1)
    pad = NPAD - 2 * c1
    w12 = jnp.pad(w12, ((0, 0), (0, pad)))
    b12 = jnp.pad(b12, ((0, 0), (0, pad)))
    return {"wtap": wtap, "bc": bc, "w12": w12, "b12": b12}


def object_model_forward(t, t_concat, k1, k2, prepped, c1=C1):
    """Pallas hot path (gather + concat + conv + relu + both heads, fused)."""
    Bsz, Ssz, H = t.shape

    grid_spec = pltpu.PrefetchScalarGridSpec(
        num_scalar_prefetch=2,    # k1, k2 -> SMEM
        grid=(1,),                # whole (tiny) problem in one step; tile rows at scale
        in_specs=[
            pl.BlockSpec((Bsz, Ssz, H), lambda i, k1r, k2r: (0, 0, 0)),        # t
            pl.BlockSpec((Bsz, Ssz, 2 * H), lambda i, k1r, k2r: (0, 0, 0)),    # t_concat
            pl.BlockSpec((3, 4 * H, H), lambda i, k1r, k2r: (0, 0, 0)),        # conv W per tap
            pl.BlockSpec((1, H), lambda i, k1r, k2r: (0, 0)),                  # conv bias
            pl.BlockSpec((H, NPAD), lambda i, k1r, k2r: (0, 0)),               # fused W1|W2 (padded)
            pl.BlockSpec((1, NPAD), lambda i, k1r, k2r: (0, 0)),               # fused b1|b2 (padded)
        ],
        out_specs=pl.BlockSpec((Bsz, Ssz, NPAD), lambda i, k1r, k2r: (0, 0, 0)),
        scratch_shapes=[pltpu.VMEM((Bsz * Ssz, 4 * H), jnp.float32)],
    )

    out = pl.pallas_call(
        object_model_kernel,
        out_shape=jax.ShapeDtypeStruct((Bsz, Ssz, NPAD), jnp.float32),
        grid_spec=grid_spec,
        compiler_params=pltpu.CompilerParams(dimension_semantics=("arbitrary",)),
    )(k1, k2, t, t_concat, prepped["wtap"], prepped["bc"], prepped["w12"], prepped["b12"])

    po1 = out[..., :c1]
    po2 = out[..., c1:2 * c1]
    return po1, po2


def reference_forward(t, t_concat, k1, k2, params):
    """Pure-JAX reference mirroring the PyTorch NCW convention."""
    bidx = jnp.arange(t.shape[0])
    k = jnp.concatenate([t[bidx, k1], t[bidx, k2]], axis=1)
    h = jnp.concatenate(
        [t_concat, jnp.broadcast_to(k[:, None, :].astype(jnp.float32), t_concat.shape)],
        axis=2)
    h_ncw = jnp.transpose(h, (0, 2, 1))                        # (B, 4H, S)
    conv = lax.conv_general_dilated(
        h_ncw, params["conv_w"], window_strides=(1,), padding=((1, 1),),
        dimension_numbers=("NCH", "OIH", "NCH"))
    conv = conv + params["conv_b"][None, :, None]
    h_conv = jnp.transpose(jax.nn.relu(conv), (0, 2, 1))       # (B, S, H)
    po1 = h_conv @ params["lin1_w"].T + params["lin1_b"]
    po2 = h_conv @ params["lin2_w"].T + params["lin2_b"]
    return po1, po2


def init_params(key):
    k_conv, k_l1, k_l2 = jax.random.split(key, 3)
    fan_in_conv = 4 * HIDDEN * 3
    params = {
        # xavier_normal-ish for conv, kaiming_normal-ish for linears, zero biases
        "conv_w": jax.random.normal(k_conv, (HIDDEN, 4 * HIDDEN, 3), jnp.float32)
                  * jnp.sqrt(2.0 / (fan_in_conv + HIDDEN)),
        "conv_b": jnp.zeros((HIDDEN,), jnp.float32),
        "lin1_w": jax.random.normal(k_l1, (C1, HIDDEN), jnp.float32) * jnp.sqrt(2.0 / HIDDEN),
        "lin1_b": jnp.zeros((C1,), jnp.float32),
        "lin2_w": jax.random.normal(k_l2, (C1, HIDDEN), jnp.float32) * jnp.sqrt(2.0 / HIDDEN),
        "lin2_b": jnp.zeros((C1,), jnp.float32),
    }
    return params


if __name__ == "__main__":
    key = jax.random.PRNGKey(0)
    k_t, k_tc, k_k1, k_k2, k_p = jax.random.split(key, 5)

    t = jax.random.normal(k_t, (B, S, HIDDEN), jnp.float32)            # encoder output
    t_concat = jax.random.normal(k_tc, (B, S, 2 * HIDDEN), jnp.float32)
    k1 = jax.random.randint(k_k1, (B,), 0, S, jnp.int32)               # subject head idx
    k2 = jax.random.randint(k_k2, (B,), 0, S, jnp.int32)               # subject tail idx
    params = init_params(k_p)

    prepped = jax.block_until_ready(prepare_params(params))            # one-time layout prep

    po1, po2 = object_model_forward(t, t_concat, k1, k2, prepped)
    jax.block_until_ready((po1, po2))

    ref1, ref2 = reference_forward(t, t_concat, k1, k2, params)
    np.testing.assert_allclose(np.asarray(po1), np.asarray(ref1), rtol=1e-4, atol=1e-4)
    np.testing.assert_allclose(np.asarray(po2), np.asarray(ref2), rtol=1e-4, atol=1e-4)

    print("KERNEL_OK")
</pallas_src>

<mosaic_0001>
module attributes {stable_mosaic.version = 11 : i64} {
  func.func @object_model_kernel(%arg0: i32, %arg1: memref<2xi32, #tpu.memory_space<smem>>, %arg2: memref<2xi32, #tpu.memory_space<smem>>, %arg3: memref<2x8x32xf32, #tpu.memory_space<vmem>>, %arg4: memref<2x8x64xf32, #tpu.memory_space<vmem>>, %arg5: memref<3x128x32xf32, #tpu.memory_space<vmem>>, %arg6: memref<1x32xf32, #tpu.memory_space<vmem>>, %arg7: memref<32x128xf32, #tpu.memory_space<vmem>>, %arg8: memref<1x128xf32, #tpu.memory_space<vmem>>, %arg9: memref<2x8x128xf32, #tpu.memory_space<vmem>>, %arg10: memref<16x128xf32, #tpu.memory_space<vmem>>) attributes {dimension_semantics = [#tpu.dimension_semantics<arbitrary>], iteration_bounds = array<i64: 1>, scalar_prefetch = 2 : i64, scratch_operands = 1 : i64, tpu.core_type = #tpu.core_type<tc>, window_params = [{pipeline_mode = #tpu.pipeline_mode<synchronous>, transform_indices = @transform_0, window_bounds = array<i64: 2, 8, 32>}, {pipeline_mode = #tpu.pipeline_mode<synchronous>, transform_indices = @transform_1, window_bounds = array<i64: 2, 8, 64>}, {pipeline_mode = #tpu.pipeline_mode<synchronous>, transform_indices = @transform_2, window_bounds = array<i64: 3, 128, 32>}, {pipeline_mode = #tpu.pipeline_mode<synchronous>, transform_indices = @transform_3, window_bounds = array<i64: 1, 32>}, {pipeline_mode = #tpu.pipeline_mode<synchronous>, transform_indices = @transform_4, window_bounds = array<i64: 32, 128>}, {pipeline_mode = #tpu.pipeline_mode<synchronous>, transform_indices = @transform_5, window_bounds = array<i64: 1, 128>}, {pipeline_mode = #tpu.pipeline_mode<synchronous>, transform_indices = @transform_6, window_bounds = array<i64: 2, 8, 128>}]} {
    %c0 = arith.constant 0 : index
    %c0_0 = arith.constant 0 : index
    %c0_1 = arith.constant 0 : index
    %0 = vector.load %arg4[%c0, %c0_0, %c0_1] : memref<2x8x64xf32, #tpu.memory_space<vmem>>, vector<1x8x64xf32>
    %1 = vector.shape_cast %0 : vector<1x8x64xf32> to vector<8x64xf32>
    %c0_2 = arith.constant 0 : index
    %c0_3 = arith.constant 0 : index
    %2 = vector.load %arg10[%c0_2, %c0_3] : memref<16x128xf32, #tpu.memory_space<vmem>>, vector<8x64xf32>
    tpu.vector_store %arg10[%c0_2, %c0_3], %1 {strides = array<i32>} : memref<16x128xf32, #tpu.memory_space<vmem>>, vector<8x64xf32>,
    %c0_4 = arith.constant 0 : index
    %3 = memref.load %arg1[%c0_4] : memref<2xi32, #tpu.memory_space<smem>>
    %c0_i32 = arith.constant 0 : i32
    %c7_i32 = arith.constant 7 : i32
    %4 = arith.maxsi %c0_i32, %3 : i32
    %5 = arith.minsi %c7_i32, %4 : i32
    %c0_5 = arith.constant 0 : index
    %6 = memref.load %arg2[%c0_5] : memref<2xi32, #tpu.memory_space<smem>>
    %c0_i32_6 = arith.constant 0 : i32
    %c7_i32_7 = arith.constant 7 : i32
    %7 = arith.maxsi %c0_i32_6, %6 : i32
    %8 = arith.minsi %c7_i32_7, %7 : i32
    %c0_8 = arith.constant 0 : index
    %9 = arith.index_cast %5 : i32 to index
    %c0_9 = arith.constant 0 : index
    %10 = vector.load %arg3[%c0_8, %9, %c0_9] : memref<2x8x32xf32, #tpu.memory_space<vmem>>, vector<1x1x32xf32>
    %11 = vector.shape_cast %10 : vector<1x1x32xf32> to vector<1x32xf32>
    %c0_10 = arith.constant 0 : index
    %12 = arith.index_cast %8 : i32 to index
    %c0_11 = arith.constant 0 : index
    %13 = vector.load %arg3[%c0_10, %12, %c0_11] : memref<2x8x32xf32, #tpu.memory_space<vmem>>, vector<1x1x32xf32>
    %14 = vector.shape_cast %13 : vector<1x1x32xf32> to vector<1x32xf32>
    %15 = vector.shape_cast %11 : vector<1x32xf32> to vector<1x32xf32>
    %16 = vector.broadcast %15 : vector<1x32xf32> to vector<8x32xf32>
    %c0_12 = arith.constant 0 : index
    %c64 = arith.constant 64 : index
    %17 = vector.load %arg10[%c0_12, %c64] : memref<16x128xf32, #tpu.memory_space<vmem>>, vector<8x32xf32>
    tpu.vector_store %arg10[%c0_12, %c64], %16 {strides = array<i32>} : memref<16x128xf32, #tpu.memory_space<vmem>>, vector<8x32xf32>,
    %18 = vector.shape_cast %14 : vector<1x32xf32> to vector<1x32xf32>
    %19 = vector.broadcast %18 : vector<1x32xf32> to vector<8x32xf32>
    %c0_13 = arith.constant 0 : index
    %c96 = arith.constant 96 : index
    %20 = vector.load %arg10[%c0_13, %c96] : memref<16x128xf32, #tpu.memory_space<vmem>>, vector<8x32xf32>
    tpu.vector_store %arg10[%c0_13, %c96], %19 {strides = array<i32>} : memref<16x128xf32, #tpu.memory_space<vmem>>, vector<8x32xf32>,
    %c1 = arith.constant 1 : index
    %c0_14 = arith.constant 0 : index
    %c0_15 = arith.constant 0 : index
    %21 = vector.load %arg4[%c1, %c0_14, %c0_15] : memref<2x8x64xf32, #tpu.memory_space<vmem>>, vector<1x8x64xf32>
    %22 = vector.shape_cast %21 : vector<1x8x64xf32> to vector<8x64xf32>
    %c8 = arith.constant 8 : index
    %c0_16 = arith.constant 0 : index
    %23 = vector.load %arg10[%c8, %c0_16] : memref<16x128xf32, #tpu.memory_space<vmem>>, vector<8x64xf32>
    tpu.vector_store %arg10[%c8, %c0_16], %22 {strides = array<i32>} : memref<16x128xf32, #tpu.memory_space<vmem>>, vector<8x64xf32>,
    %c1_17 = arith.constant 1 : index
    %24 = memref.load %arg1[%c1_17] : memref<2xi32, #tpu.memory_space<smem>>
    %c0_i32_18 = arith.constant 0 : i32
    %c7_i32_19 = arith.constant 7 : i32
    %25 = arith.maxsi %c0_i32_18, %24 : i32
    %26 = arith.minsi %c7_i32_19, %25 : i32
    %c1_20 = arith.constant 1 : index
    %27 = memref.load %arg2[%c1_20] : memref<2xi32, #tpu.memory_space<smem>>
    %c0_i32_21 = arith.constant 0 : i32
    %c7_i32_22 = arith.constant 7 : i32
    %28 = arith.maxsi %c0_i32_21, %27 : i32
    %29 = arith.minsi %c7_i32_22, %28 : i32
    %c1_23 = arith.constant 1 : index
    %30 = arith.index_cast %26 : i32 to index
    %c0_24 = arith.constant 0 : index
    %31 = vector.load %arg3[%c1_23, %30, %c0_24] : memref<2x8x32xf32, #tpu.memory_space<vmem>>, vector<1x1x32xf32>
    %32 = vector.shape_cast %31 : vector<1x1x32xf32> to vector<1x32xf32>
    %c1_25 = arith.constant 1 : index
    %33 = arith.index_cast %29 : i32 to index
    %c0_26 = arith.constant 0 : index
    %34 = vector.load %arg3[%c1_25, %33, %c0_26] : memref<2x8x32xf32, #tpu.memory_space<vmem>>, vector<1x1x32xf32>
    %35 = vector.shape_cast %34 : vector<1x1x32xf32> to vector<1x32xf32>
    %36 = vector.shape_cast %32 : vector<1x32xf32> to vector<1x32xf32>
    %37 = vector.broadcast %36 : vector<1x32xf32> to vector<8x32xf32>
    %c8_27 = arith.constant 8 : index
    %c64_28 = arith.constant 64 : index
    %38 = vector.load %arg10[%c8_27, %c64_28] : memref<16x128xf32, #tpu.memory_space<vmem>>, vector<8x32xf32>
    tpu.vector_store %arg10[%c8_27, %c64_28], %37 {strides = array<i32>} : memref<16x128xf32, #tpu.memory_space<vmem>>, vector<8x32xf32>,
    %39 = vector.shape_cast %35 : vector<1x32xf32> to vector<1x32xf32>
    %40 = vector.broadcast %39 : vector<1x32xf32> to vector<8x32xf32>
    %c8_29 = arith.constant 8 : index
    %c96_30 = arith.constant 96 : index
    %41 = vector.load %arg10[%c8_29, %c96_30] : memref<16x128xf32, #tpu.memory_space<vmem>>, vector<8x32xf32>
    tpu.vector_store %arg10[%c8_29, %c96_30], %40 {strides = array<i32>} : memref<16x128xf32, #tpu.memory_space<vmem>>, vector<8x32xf32>,
    %c0_31 = arith.constant 0 : index
    %c0_32 = arith.constant 0 : index
    %42 = vector.load %arg10[%c0_31, %c0_32] : memref<16x128xf32, #tpu.memory_space<vmem>>, vector<16x128xf32>
    %43 = tpu.iota {dimensions = array<i32: 0>} : vector<16x1xi32>
    %c8_i32 = arith.constant 8 : i32
    %c0_i32_33 = arith.constant 0 : i32
    %44 = arith.cmpi eq, %c8_i32, %c0_i32_33 : i32
    %c1_i32 = arith.constant 1 : i32
    %45 = arith.select %44, %c1_i32, %c8_i32 : i32
    %46 = vector.broadcast %45 : i32 to vector<16x1xi32>
    %47 = arith.remsi %43, %46 : vector<16x1xi32>
    %c0_i32_34 = arith.constant 0 : i32
    %48 = vector.broadcast %c0_i32_34 : i32 to vector<16x1xi32>
    %49 = arith.cmpi ne, %47, %48 : vector<16x1xi32>
    %c0_i32_35 = arith.constant 0 : i32
    %50 = vector.broadcast %c0_i32_35 : i32 to vector<16x1xi32>
    %51 = arith.cmpi slt, %47, %50 : vector<16x1xi32>
    %c0_i32_36 = arith.constant 0 : i32
    %52 = arith.cmpi slt, %45, %c0_i32_36 : i32
    %53 = vector.broadcast %52 : i1 to vector<16x1xi1>
    %54 = vector.broadcast %53 : vector<16x1xi1> to vector<16x1xi1>
    %55 = arith.xori %51, %54 : vector<16x1xi1>
    %56 = arith.andi %55, %49 : vector<16x1xi1>
    %57 = vector.broadcast %45 : i32 to vector<16x1xi32>
    %58 = arith.addi %47, %57 : vector<16x1xi32>
    %59 = arith.select %56, %58, %47 : vector<16x1xi1>, vector<16x1xi32>
    %c0_i32_37 = arith.constant 0 : i32
    %60 = vector.broadcast %c0_i32_37 : i32 to vector<16x1xi32>
    %61 = arith.cmpi eq, %59, %60 : vector<16x1xi32>
    %c1_i32_38 = arith.constant 1 : i32
    %62 = tpu.dynamic_rotate %42 by %c1_i32_38 dim 0 : vector<16x128xf32>, i32 -> vector<16x128xf32>
    %cst = arith.constant 0.000000e+00 : f32
    %63 = vector.shape_cast %61 : vector<16x1xi1> to vector<16x1xi1>
    %64 = vector.broadcast %63 : vector<16x1xi1> to vector<16x128xi1>
    %65 = vector.broadcast %cst : f32 to vector<16x128xf32>
    %66 = arith.select %64, %65, %62 : vector<16x128xi1>, vector<16x128xf32>
    %c7_i32_39 = arith.constant 7 : i32
    %67 = vector.broadcast %c7_i32_39 : i32 to vector<16x1xi32>
    %68 = arith.cmpi eq, %59, %67 : vector<16x1xi32>
    %c15_i32 = arith.constant 15 : i32
    %69 = tpu.dynamic_rotate %42 by %c15_i32 dim 0 : vector<16x128xf32>, i32 -> vector<16x128xf32>
    %cst_40 = arith.constant 0.000000e+00 : f32
    %70 = vector.shape_cast %68 : vector<16x1xi1> to vector<16x1xi1>
    %71 = vector.broadcast %70 : vector<16x1xi1> to vector<16x128xi1>
    %72 = vector.broadcast %cst_40 : f32 to vector<16x128xf32>
    %73 = arith.select %71, %72, %69 : vector<16x128xi1>, vector<16x128xf32>
    %c0_41 = arith.constant 0 : index
    %c0_42 = arith.constant 0 : index
    %c0_43 = arith.constant 0 : index
    %74 = vector.load %arg5[%c0_41, %c0_42, %c0_43] : memref<3x128x32xf32, #tpu.memory_space<vmem>>, vector<1x128x32xf32>
    %75 = vector.shape_cast %74 : vector<1x128x32xf32> to vector<128x32xf32>
    %cst_44 = arith.constant dense<0.000000e+00> : vector<16x32xf32>
    %76 = tpu.matmul %66, %75, %cst_44 {dimension_numbers = #tpu.dot_dimension_numbers<[1], [0], [0], [1], [0, 0, 1, 1], [], []>} : vector<16x128xf32>, vector<128x32xf32>, vector<16x32xf32> -> vector<16x32xf32>
    %c1_45 = arith.constant 1 : index
    %c0_46 = arith.constant 0 : index
    %c0_47 = arith.constant 0 : index
    %77 = vector.load %arg5[%c1_45, %c0_46, %c0_47] : memref<3x128x32xf32, #tpu.memory_space<vmem>>, vector<1x128x32xf32>
    %78 = vector.shape_cast %77 : vector<1x128x32xf32> to vector<128x32xf32>
    %cst_48 = arith.constant dense<0.000000e+00> : vector<16x32xf32>
    %79 = tpu.matmul %42, %78, %cst_48 {dimension_numbers = #tpu.dot_dimension_numbers<[1], [0], [0], [1], [0, 0, 1, 1], [], []>} : vector<16x128xf32>, vector<128x32xf32>, vector<16x32xf32> -> vector<16x32xf32>
    %80 = arith.addf %76, %79 : vector<16x32xf32>
    %c2 = arith.constant 2 : index
    %c0_49 = arith.constant 0 : index
    %c0_50 = arith.constant 0 : index
    %81 = vector.load %arg5[%c2, %c0_49, %c0_50] : memref<3x128x32xf32, #tpu.memory_space<vmem>>, vector<1x128x32xf32>
    %82 = vector.shape_cast %81 : vector<1x128x32xf32> to vector<128x32xf32>
    %cst_51 = arith.constant dense<0.000000e+00> : vector<16x32xf32>
    %83 = tpu.matmul %73, %82, %cst_51 {dimension_numbers = #tpu.dot_dimension_numbers<[1], [0], [0], [1], [0, 0, 1, 1], [], []>} : vector<16x128xf32>, vector<128x32xf32>, vector<16x32xf32> -> vector<16x32xf32>
    %84 = arith.addf %80, %83 : vector<16x32xf32>
    %c0_52 = arith.constant 0 : index
    %c0_53 = arith.constant 0 : index
    %85 = vector.load %arg6[%c0_52, %c0_53] : memref<1x32xf32, #tpu.memory_space<vmem>>, vector<1x32xf32>
    %86 = vector.broadcast %85 : vector<1x32xf32> to vector<16x32xf32>
    %87 = arith.addf %84, %86 : vector<16x32xf32>
    %cst_54 = arith.constant 0.000000e+00 : f32
    %88 = vector.broadcast %cst_54 : f32 to vector<16x32xf32>
    %89 = arith.maximumf %87, %88 : vector<16x32xf32>
    %c0_55 = arith.constant 0 : index
    %c0_56 = arith.constant 0 : index
    %90 = vector.load %arg7[%c0_55, %c0_56] : memref<32x128xf32, #tpu.memory_space<vmem>>, vector<32x128xf32>
    %cst_57 = arith.constant dense<0.000000e+00> : vector<16x128xf32>
    %91 = tpu.matmul %89, %90, %cst_57 {dimension_numbers = #tpu.dot_dimension_numbers<[1], [0], [0], [1], [0, 0, 1, 1], [], []>} : vector<16x32xf32>, vector<32x128xf32>, vector<16x128xf32> -> vector<16x128xf32>
    %c0_58 = arith.constant 0 : index
    %c0_59 = arith.constant 0 : index
    %92 = vector.load %arg8[%c0_58, %c0_59] : memref<1x128xf32, #tpu.memory_space<vmem>>, vector<1x128xf32>
    %93 = vector.broadcast %92 : vector<1x128xf32> to vector<16x128xf32>
    %94 = arith.addf %91, %93 : vector<16x128xf32>
    %95 = vector.shape_cast %94 : vector<16x128xf32> to vector<2x8x128xf32>
    %c0_60 = arith.constant 0 : index
    %c0_61 = arith.constant 0 : index
    %c0_62 = arith.constant 0 : index
    %96 = vector.load %arg9[%c0_60, %c0_61, %c0_62] : memref<2x8x128xf32, #tpu.memory_space<vmem>>, vector<2x8x128xf32>
    tpu.vector_store %arg9[%c0_60, %c0_61, %c0_62], %95 {strides = array<i32>} : memref<2x8x128xf32, #tpu.memory_space<vmem>>, vector<2x8x128xf32>,
    return
  }
  func.func @transform_0(%arg0: i32, %arg1: memref<2xi32, #tpu.memory_space<smem>>, %arg2: memref<2xi32, #tpu.memory_space<smem>>) -> (i32, i32, i32) {
    %c0_i32 = arith.constant 0 : i32
    %c0_i32_0 = arith.constant 0 : i32
    %c0_i32_1 = arith.constant 0 : i32
    %c0_i32_2 = arith.constant 0 : i32
    return %c0_i32, %c0_i32_0, %c0_i32_1 : i32, i32, i32
  }
  func.func @transform_1(%arg0: i32, %arg1: memref<2xi32, #tpu.memory_space<smem>>, %arg2: memref<2xi32, #tpu.memory_space<smem>>) -> (i32, i32, i32) {
    %c0_i32 = arith.constant 0 : i32
    %c0_i32_0 = arith.constant 0 : i32
    %c0_i32_1 = arith.constant 0 : i32
    %c0_i32_2 = arith.constant 0 : i32
    return %c0_i32, %c0_i32_0, %c0_i32_1 : i32, i32, i32
  }
  func.func @transform_2(%arg0: i32, %arg1: memref<2xi32, #tpu.memory_space<smem>>, %arg2: memref<2xi32, #tpu.memory_space<smem>>) -> (i32, i32, i32) {
    %c0_i32 = arith.constant 0 : i32
    %c0_i32_0 = arith.constant 0 : i32
    %c0_i32_1 = arith.constant 0 : i32
    %c0_i32_2 = arith.constant 0 : i32
    return %c0_i32, %c0_i32_0, %c0_i32_1 : i32, i32, i32
  }
  func.func @transform_3(%arg0: i32, %arg1: memref<2xi32, #tpu.memory_space<smem>>, %arg2: memref<2xi32, #tpu.memory_space<smem>>) -> (i32, i32) {
    %c0_i32 = arith.constant 0 : i32
    %c0_i32_0 = arith.constant 0 : i32
    %c0_i32_1 = arith.constant 0 : i32
    return %c0_i32, %c0_i32_0 : i32, i32
  }
  func.func @transform_4(%arg0: i32, %arg1: memref<2xi32, #tpu.memory_space<smem>>, %arg2: memref<2xi32, #tpu.memory_space<smem>>) -> (i32, i32) {
    %c0_i32 = arith.constant 0 : i32
    %c0_i32_0 = arith.constant 0 : i32
    %c0_i32_1 = arith.constant 0 : i32
    return %c0_i32, %c0_i32_0 : i32, i32
  }
  func.func @transform_5(%arg0: i32, %arg1: memref<2xi32, #tpu.memory_space<smem>>, %arg2: memref<2xi32, #tpu.memory_space<smem>>) -> (i32, i32) {
    %c0_i32 = arith.constant 0 : i32
    %c0_i32_0 = arith.constant 0 : i32
    %c0_i32_1 = arith.constant 0 : i32
    return %c0_i32, %c0_i32_0 : i32, i32
  }
  func.func @transform_6(%arg0: i32, %arg1: memref<2xi32, #tpu.memory_space<smem>>, %arg2: memref<2xi32, #tpu.memory_space<smem>>) -> (i32, i32, i32) {
    %c0_i32 = arith.constant 0 : i32
    %c0_i32_0 = arith.constant 0 : i32
    %c0_i32_1 = arith.constant 0 : i32
    %c0_i32_2 = arith.constant 0 : i32
    return %c0_i32, %c0_i32_0, %c0_i32_1 : i32, i32, i32
  }
}

</mosaic_0001>

<bundles_post_ra>
// kernel: tpu_custom_call.1
= control target key start
LH: loop header
LB: loop body
LE: loop exit
PB: predicated region body
PF: predicated region fallthrough
CT: control target
= control target key end

     0   :  { %s1186_s0 = inlined_call_operand.vmem [shape: s32[2], index: 0, kind: input, shape index: {}]   ;;  %s1187_s2 = inlined_call_operand.vmem [shape: f32[2,8,32], index: 2, kind: input, shape index: {}]   ;;  %s1188_s3 = inlined_call_operand.vmem [shape: f32[2,8,64], index: 3, kind: input, shape index: {}]   ;;  %s1189_s4 = inlined_call_operand.vmem [shape: f32[3,128,32], index: 4, kind: input, shape index: {}]   ;;  %s1190_s5 = inlined_call_operand.vmem [shape: f32[1,32], index: 5, kind: input, shape index: {}]   ;;  %s1191_s6 = inlined_call_operand.vmem [shape: f32[32,128], index: 6, kind: input, shape index: {}]   ;;  %s1192_s7 = inlined_call_operand.vmem [shape: f32[1,128], index: 7, kind: input, shape index: {}]   ;;  %s1193_s8 = inlined_call_operand.hbm [shape: f32[2,8,128], index: 8, kind: output, shape index: {}]   ;;  %s1194_s1 = inlined_call_operand.vmem [shape: s32[2], index: 1, kind: input, shape index: {}]  }
   0x1   :  { %s13_s29 = sshll.u32 %s1186_s0, 4  ;;  %s17_s10 = sshll.u32 %s1194_s1, 4  ;;  %s14_s29 = int_to_ptr.vmem [resolvable:$true] %s13_s29  ;;  %s18_s10 = int_to_ptr.vmem [resolvable:$true] %s17_s10 }
   0x2   :  { %s838_s11 = scalar_lea.vmem %s14_s29, 16  ;;  %p843_p1 = scmp.lt.s32.totalorder %s14_s29, %s14_s29 }
   0x3   :  { %p839_p0 = scmp.ne.s32.totalorder %s14_s29, %s838_s11  ;;  %p844_p2 = scmp.lt.s32.totalorder %s838_s11, %s838_s11 }
   0x5   :  { %p845_p3 = por %p844_p2, %p843_p1 }
   0x7   :  { %p846_p4 = pnand %p845_p3, %p839_p0 }
   0x9   :  { %849 = shalt.err (!%p846_p4)  }
   0xa   :  { %s886_s12 = smov [#allocation4]   ;;  %s850_s13 = scalar_lea.vmem %s18_s10, 16 }
   0xb   :  { %16 = dma.vmem_to_smem %s14_s29, 16, %s886_s12, [#allocation3] }
   0xc   :  { %p851_p5 = scmp.ne.s32.totalorder %s18_s10, %s850_s13  ;;  %p855_p6 = scmp.lt.s32.totalorder %s18_s10, %s18_s10 }
   0xd   :  { %p856_p7 = scmp.lt.s32.totalorder %s850_s13, %s850_s13 }
   0xf   :  { %p857_p8 = por %p856_p7, %p855_p6 }
  0x11   :  { %p858_p9 = pnand %p857_p8, %p851_p5 }
  0x13   :  { %861 = shalt.err (!%p858_p9)  }
  0x14   :  { %s887_s0 = smov [#allocation5]  }
  0x15   :  { %20 = dma.vmem_to_smem %s18_s10, 16, %s887_s0, [#allocation3] }
  0x16   :  { %882 = dma.done.wait [#allocation3], 32 }
  0x17   :  { %883 = vsyncadd [#allocation3], 4294967264 }
  0x18   :  { %22 = sfence }
  0x19   :  { %s944_s1 = sld [smem:[#allocation4 + $0x1]]  ;;  %v614_v0 = vld [vmem:[%s1189_s4 + $0xf8] sm:$0xff]  ;;  %v613_v1 = vld [vmem:[%s1189_s4 + $0xf0] sm:$0xff]  ;;  %v612_v4 = vld [vmem:[%s1189_s4 + $0xe8] sm:$0xff]  ;;  %vm37_vm0 = vcmask 523264  }
  0x1a   :  { %s952_s18 = sld [smem:[#allocation4]]  ;;  %715 = vmatprep.subr.mxu0 %v614_v0  ;;  %v180_v2 = vld [vmem:[%s1189_s4 + $0x78] sm:$0xff]  ;;  %v179_v3 = vld [vmem:[%s1189_s4 + $0x70] sm:$0xff]  ;;  %v178_v5 = vld [vmem:[%s1189_s4 + $0x68] sm:$0xff] }
  0x1b   :  { %716 = vmatpush3.msra.mxu0 %v614_v0  ;;  %750 = vmatprep.subr.mxu1 %v180_v2  ;;  %s966_s27 = sld [smem:[#allocation5 + $0x1]]  ;;  %v611_v6 = vld [vmem:[%s1189_s4 + $0xe0] sm:$0xff]  ;;  %v610_v8 = vld [vmem:[%s1189_s4 + $0xd8] sm:$0xff]  ;;  %v582_v9 = vld [vmem:[%s1188_s3 + $0x8] sm:$0xff] }
  0x1c   :  { %717 = vmatprep.subr.mxu0 %v613_v1  ;;  %751 = vmatpush3.msra.mxu1 %v180_v2  ;;  %s971_s30 = sld [smem:[#allocation5]]  ;;  %v177_v7 = vld [vmem:[%s1189_s4 + $0x60] sm:$0xff]  ;;  %v176_v11 = vld [vmem:[%s1189_s4 + $0x58] sm:$0xff]  ;;  %75 = vst.msk [vmem:[#allocation2 + $0x8] sm:$0xff] %vm37_vm0, %v582_v9  ;;  %v609_v12 = vld [vmem:[%s1189_s4 + $0xd0] sm:$0xff] }
  0x1d   :  { %718 = vmatpush3.msra.mxu0 %v613_v1  ;;  %752 = vmatprep.subr.mxu1 %v179_v3  ;;  %v36_v10 = vld [vmem:[%s1188_s3] sm:$0xff] }
  0x1e   :  { %719 = vmatprep.subr.mxu0 %v612_v4  ;;  %753 = vmatpush3.msra.mxu1 %v179_v3  ;;  %38 = vst.msk [vmem:[#allocation2] sm:$0xff] %vm37_vm0, %v36_v10 }
  0x1f   :  { %p77_p10 = scmp.gt.s32.totalorder %s944_s1, 0  ;;  %p584_p11 = scmp.lt.s32.totalorder %s944_s1, 7  ;;  %720 = vmatpush3.msra.mxu0 %v612_v4  ;;  %754 = vmatprep.subr.mxu1 %v178_v5 }
  0x20   :  { %p40_p12 = scmp.gt.s32.totalorder %s952_s18, 0  ;;  %p570_p13 = scmp.lt.s32.totalorder %s952_s18, 7  ;;  %721 = vmatprep.subr.mxu0 %v611_v6  ;;  %755 = vmatpush3.msra.mxu1 %v178_v5 }
  0x21   :  { %s78_s19 = scalar_select %p77_p10, %s944_s1, 0  ;;  %722 = vmatpush3.msra.mxu0 %v611_v6  ;;  %756 = vmatprep.subr.mxu1 %v177_v7 }
  0x22   :  { %23 = vsyncpa [#allocation7], 0  ;;  %s41_s3 = scalar_select %p40_p12, %s952_s18, 0  ;;  %723 = vmatprep.subr.mxu0 %v610_v8  ;;  %757 = vmatpush3.msra.mxu1 %v177_v7  ;;  %v175_v13 = vld [vmem:[%s1189_s4 + $0x50] sm:$0xff]  ;;  %v608_v14 = vld [vmem:[%s1189_s4 + $0xc8] sm:$0xff]  ;;  %vm61_vm1 = vcmask 785920   ;;  %v112_v41 = vlaneseq }
  0x23   :  { %s1196_s19 = smov (!%p584_p11, %s78_s19), 7  ;;  %724 = vmatpush3.msra.mxu0 %v610_v8  ;;  %758 = vmatprep.subr.mxu1 %v176_v11  ;;  %p82_p0 = scmp.gt.s32.totalorder %s966_s27, 0  ;;  %v607_v15 = vld [vmem:[%s1189_s4 + $0xc0] sm:$0xff]  ;;  %v174_v17 = vld [vmem:[%s1189_s4 + $0x48] sm:$0xff]  ;;  %v606_v19 = vld [vmem:[%s1189_s4 + $0xb8] sm:$0xff]  ;;  %vm71_vm2 = vcmask 1048320  }
  0x24   :  { %s1198_s3 = smov (!%p570_p13, %s41_s3), 7  ;;  %725 = vmatprep.subr.mxu0 %v609_v12  ;;  %759 = vmatpush3.msra.mxu1 %v176_v11  ;;  %s566_s29 = scalar_lea.vmem %s1187_s2, %s1196_s19  ;;  %v173_v20 = vld [vmem:[%s1189_s4 + $0x40] sm:$0xff]  ;;  %v605_v21 = vld [vmem:[%s1189_s4 + $0xb0] sm:$0xff]  ;;  %v604_v22 = vld [vmem:[%s1189_s4 + $0xa8] sm:$0xff]  ;;  %v1093_v43 = vshrl.u32 %v112_v41, 7  ;;  %vm464_vm9 = vcmask 261120  }
  0x25   :  { %726 = vmatpush3.msra.mxu0 %v609_v12  ;;  %760 = vmatprep.subr.mxu1 %v175_v13  ;;  %v597_v16 = vld [vmem:[%s566_s29 + $0x8] ss:$0 sm:$0xff]  ;;  %s49_s11 = scalar_lea.vmem %s1187_s2, %s1198_s3  ;;  %p590_p1 = scmp.lt.s32.totalorder %s966_s27, 7  ;;  %v172_v23 = vld [vmem:[%s1189_s4 + $0x38] sm:$0xff]  ;;  %v603_v25 = vld [vmem:[%s1189_s4 + $0xa0] sm:$0xff] }
  0x26   :  { %727 = vmatprep.subr.mxu0 %v608_v14  ;;  %761 = vmatpush3.msra.mxu1 %v175_v13  ;;  %s888_s0 = smov 64   ;;  %v580_v18 = vld [vmem:[%s49_s11] ss:$0 sm:$0xff]  ;;  %p45_p2 = scmp.gt.s32.totalorder %s971_s30, 0  ;;  %v171_v26 = vld [vmem:[%s1189_s4 + $0x30] sm:$0xff]  ;;  %v602_v28 = vld [vmem:[%s1189_s4 + $0x98] sm:$0xff] }
  0x27   :  { %97 = vrot.lane.b32.xlu1 %v597_v16, %s888_s0  ;;  %s83_s14 = scalar_select %p82_p0, %s966_s27, 0  ;;  %728 = vmatpush3.msra.mxu0 %v608_v14  ;;  %v170_v29 = vld [vmem:[%s1189_s4 + $0x28] sm:$0xff]  ;;  %v601_v30 = vld [vmem:[%s1189_s4 + $0x90] sm:$0xff]  ;;  %v169_v31 = vld [vmem:[%s1189_s4 + $0x20] sm:$0xff]  ;;  %v1096_v45 = vadd.s32 8, %v1093_v43  ;;  %v119_v47 = vand.u32 7, %v1093_v43 }
  0x28   :  { %58 = vrot.lane.b32.xlu0 %v580_v18, %s888_s0  ;;  %p575_p3 = scmp.lt.s32.totalorder %s971_s30, 7  ;;  %729 = vmatprep.subr.mxu0 %v607_v15  ;;  %s889_s29 = smov 96   ;;  %v600_v32 = vld [vmem:[%s1189_s4 + $0x88] sm:$0xff]  ;;  %v168_v33 = vld [vmem:[%s1189_s4 + $0x18] sm:$0xff]  ;;  %v599_v34 = vld [vmem:[%s1189_s4 + $0x80] sm:$0xff]  ;;  %vm143_vm3 = vcmp.lt.s32.totalorder %v1093_v43, 1 }
  0x29   :  { %s1200_s14 = smov (!%p590_p1, %s83_s14), 7  ;;  %730 = vmatpush3.msra.mxu0 %v607_v15  ;;  %762 = vmatprep.subr.mxu1 %v174_v17  ;;  %v167_v35 = vld [vmem:[%s1189_s4 + $0x10] sm:$0xff]  ;;  %v634_v36 = vld [vmem:[%s1189_s4 + $0x178] sm:$0xff]  ;;  %v166_v37 = vld [vmem:[%s1189_s4 + $0x8] sm:$0xff]  ;;  %v126_v50 = vand.u32 7, %v1096_v45  ;;  %vm156_vm4 = vcmp.lt.s32.totalorder %v1093_v43, 7 }
  0x2a   :  { %s46_s3 = scalar_select %p45_p2, %s971_s30, 0  ;;  %731 = vmatprep.subr.mxu0 %v606_v19  ;;  %763 = vmatpush3.msra.mxu1 %v174_v17  ;;  %v165_v38 = vld [vmem:[%s1189_s4] sm:$0xff]  ;;  %v633_v54 = vld [vmem:[%s1189_s4 + $0x170] sm:$0xff]  ;;  %vm651_vm5 = vcmp.ne.s32.totalorder %v119_v47, 0  ;;  %vm653_vm6 = vcmp.ne.s32.totalorder %v119_v47, 7  ;;  %v632_v58 = vld [vmem:[%s1189_s4 + $0x168] sm:$0xff] }
  0x2b   :  { %s568_s24 = scalar_lea.vmem %s1187_s2, %s1200_s14  ;;  %732 = vmatpush3.msra.mxu0 %v606_v19  ;;  %764 = vmatprep.subr.mxu1 %v173_v20  ;;  %vm652_vm7 = vcmp.ne.s32.totalorder %v126_v50, 0  ;;  %v631_v59 = vld [vmem:[%s1189_s4 + $0x160] sm:$0xff]  ;;  %v630_v60 = vld [vmem:[%s1189_s4 + $0x158] sm:$0xff]  ;;  %v629_v61 = vld [vmem:[%s1189_s4 + $0x150] sm:$0xff]  ;;  %vm654_vm8 = vcmp.ne.s32.totalorder %v126_v50, 7 }
  0x2c   :  { %v598_v24 = vld [vmem:[%s568_s24 + $0x8] ss:$0 sm:$0xff]  ;;  %s1202_s3 = smov (!%p575_p3, %s46_s3), 7  ;;  %733 = vmatprep.subr.mxu0 %v605_v21  ;;  %765 = vmatpush3.msra.mxu1 %v173_v20  ;;  %v627_v63 = vld [vmem:[%s1189_s4 + $0x140] sm:$0xff]  ;;  %v626_v0 = vld [vmem:[%s1189_s4 + $0x138] sm:$0xff] }
  0x2d   :  { %106 = vrot.lane.b32.xlu1 %v598_v24, %s889_s29  ;;  %734 = vmatpush3.msra.mxu0 %v605_v21  ;;  %s51_s11 = scalar_lea.vmem %s1187_s2, %s1202_s3  ;;  %v628_v62 = vld [vmem:[%s1189_s4 + $0x148] sm:$0xff]  ;;  %v625_v1 = vld [vmem:[%s1189_s4 + $0x130] sm:$0xff]  ;;  %v623_v3 = vld [vmem:[%s1189_s4 + $0x120] sm:$0xff]  ;;  %s890_s3 = smov [#allocation6]  }
  0x2e   :  { %735 = vmatprep.subr.mxu0 %v604_v22  ;;  %766 = vmatprep.subr.mxu1 %v172_v23  ;;  %v581_v27 = vld [vmem:[%s51_s11] ss:$0 sm:$0xff]  ;;  %v624_v2 = vld [vmem:[%s1189_s4 + $0x128] sm:$0xff]  ;;  %v622_v4 = vld [vmem:[%s1189_s4 + $0x118] sm:$0xff]  ;;  %s553_s22 = sshll.u32 %s890_s3, 4  ;;  %s554_s22 = int_to_ptr.vmem [resolvable:$true] %s553_s22 }
  0x2f   :  { %736 = vmatpush3.msra.mxu0 %v604_v22  ;;  %767 = vmatpush3.msra.mxu1 %v172_v23  ;;  %v621_v5 = vld [vmem:[%s1189_s4 + $0x110] sm:$0xff]  ;;  %v620_v6 = vld [vmem:[%s1189_s4 + $0x108] sm:$0xff]  ;;  %v619_v7 = vld [vmem:[%s1189_s4 + $0x100] sm:$0xff]  ;;  %p867_p5 = scmp.lt.s32.totalorder %s554_s22, %s554_s22 }
  0x30   :  { %68 = vrot.lane.b32.xlu0 %v581_v27, %s889_s29  ;;  %737 = vmatprep.subr.mxu0 %v603_v25  ;;  %v456_v9 = vld [vmem:[%s1191_s6 + $0x18] sm:$0xff]  ;;  %v455_v10 = vld [vmem:[%s1191_s6 + $0x10] sm:$0xff]  ;;  %v454_v11 = vld [vmem:[%s1191_s6 + $0x8] sm:$0xff] }
  0x31   :  { %768 = vmatprep.subr.mxu1 %v171_v26  ;;  %738 = vmatpush3.msra.mxu0 %v603_v25  ;;  %v453_v12 = vld [vmem:[%s1191_s6] sm:$0xff] }
  0x32   :  { %769 = vmatpush3.msra.mxu1 %v171_v26  ;;  %739 = vmatprep.subr.mxu0 %v602_v28  ;;  %v639_v21 = vld [vmem:[%s1190_s5] ss:$0 sm:$0xff]  ;;  %s862_s5 = scalar_lea.vmem %s554_s22, 256 }
  0x33   :  { %770 = vmatprep.subr.mxu1 %v170_v29  ;;  %740 = vmatpush3.msra.mxu0 %v602_v28  ;;  %v640_v28 = vld [vmem:[%s1192_s7] ss:$0 sm:$0xff]  ;;  %p863_p4 = scmp.ne.s32.totalorder %s554_s22, %s862_s5  ;;  %p868_p6 = scmp.lt.s32.totalorder %s862_s5, %s862_s5 }
  0x34   :  { %771 = vmatpush3.msra.mxu1 %v170_v29  ;;  %741 = vmatprep.subr.mxu0 %v601_v30 }
  0x35   :  { %772 = vmatprep.subr.mxu1 %v169_v31  ;;  %742 = vmatpush3.msra.mxu0 %v601_v30  ;;  %p869_p7 = por %p868_p6, %p867_p5 }
  0x36   :  { %773 = vmatpush3.msra.mxu1 %v169_v31  ;;  %743 = vmatprep.subr.mxu0 %v600_v32 }
  0x37   :  { %774 = vmatprep.subr.mxu1 %v168_v33  ;;  %744 = vmatpush3.msra.mxu0 %v600_v32  ;;  %p870_p8 = pnand %p869_p7, %p863_p4 }
  0x38   :  { %775 = vmatpush3.msra.mxu1 %v168_v33  ;;  %745 = vmatprep.subr.mxu0 %v599_v34 }
  0x39   :  { %776 = vmatprep.subr.mxu1 %v167_v35  ;;  %746 = vmatpush3.msra.mxu0 %v599_v34 }
  0x3a   :  { %777 = vmatpush3.msra.mxu1 %v167_v35  ;;  %785 = vmatprep.subr.mxu0 %v634_v36 }
  0x3b   :  { %778 = vmatprep.subr.mxu1 %v166_v37 }
  0x3c   :  { %779 = vmatpush3.msra.mxu1 %v166_v37 }
  0x3d   :  { %780 = vmatprep.subr.mxu1 %v165_v38 }
  0x3e   :  { %781 = vmatpush3.msra.mxu1 %v165_v38 }
  0x3f   :  { %820 = vmatprep.subr.mxu1 %v456_v9 }
  0x99   :  { %v98_v39 = vpop.permute.xlu1 %97 }
  0x9a   :  { %100 = vst.msk [vmem:[#allocation2 + $0x8] sm:$0xff] %vm61_vm1, %v98_v39  ;;  %v59_v40 = vpop.permute.xlu0 %58 }
  0x9b   :  { %62 = vst.msk [vmem:[#allocation2] sm:$0xff] %vm61_vm1, %v59_v40 }
  0x9f   :  { %v107_v42 = vpop.permute.xlu1 %106 }
  0xa0   :  { %109 = vst.msk [vmem:[#allocation2 + $0x8] sm:$0xff] %vm71_vm2, %v107_v42 }
  0xa2   :  { %v69_v44 = vpop.permute.xlu0 %68 }
  0xa3   :  { %72 = vst.msk [vmem:[#allocation2] sm:$0xff] %vm71_vm2, %v69_v44 }
  0xa7   :  { %v1098_v46 = vld [vmem:[#allocation2 + $0x8] sm:$0xff] }
  0xa8   :  { %v142_v48 = vrot.slane %v1098_v46, 7  ;;  %v155_v49 = vrot.slane %v1098_v46, 1 }
  0xaa   :  { %v1104_v51 = vld [vmem:[#allocation2] sm:$0xff] }
  0xab   :  { %v141_v52 = vrot.slane %v1104_v51, 7  ;;  %v154_v53 = vrot.slane %v1104_v51, 1  ;;  %747 = vmatprep.mubr.f32.mxu0 %v1104_v51 }
  0xac   :  { %748 = vmatmul.mubr.f32.vlgmr.msra.gmra.mxu0 %v1098_v46 }
  0xad   :  { %786 = vmatpush3.msra.mxu0 %v634_v36  ;;  %v145_v55 = vsel %vm143_vm3, %v142_v48, %v141_v52  ;;  %v157_v56 = vsel %vm156_vm4, %v154_v53, %v155_v49  ;;  %v144_v57 = vsel %vm143_vm3, %v141_v52, %v142_v48  ;;  %v158_v8 = vsel %vm156_vm4, %v155_v49, %v154_v53 }
  0xae   :  { %787 = vmatprep.subr.mxu0 %v633_v54  ;;  %782 = vmatprep.mubr.msk.f32.mxu1 %vm651_vm5, %v145_v55 }
  0xaf   :  { %788 = vmatpush3.msra.mxu0 %v633_v54  ;;  %817 = vmatprep.mubr.msk.f32.mxu0 %vm653_vm6, %v157_v56 }
  0xb0   :  { %783 = vmatmul.mubr.msk.f32.vlgmr.msra.gmra.mxu1 %vm652_vm7, %v144_v57  ;;  %789 = vmatprep.subr.mxu0 %v632_v58 }
  0xb1   :  { %790 = vmatpush3.msra.mxu0 %v632_v58  ;;  %821 = vmatpush3.msra.mxu1 %v456_v9 }
  0xb2   :  { %791 = vmatprep.subr.mxu0 %v631_v59  ;;  %822 = vmatprep.subr.mxu1 %v455_v10 }
  0xb3   :  { %792 = vmatpush3.msra.mxu0 %v631_v59  ;;  %823 = vmatpush3.msra.mxu1 %v455_v10 }
  0xb4   :  { %793 = vmatprep.subr.mxu0 %v630_v60  ;;  %824 = vmatprep.subr.mxu1 %v454_v11 }
  0xb5   :  { %794 = vmatpush3.msra.mxu0 %v630_v60  ;;  %825 = vmatpush3.msra.mxu1 %v454_v11 }
  0xb6   :  { %795 = vmatprep.subr.mxu0 %v629_v61  ;;  %826 = vmatprep.subr.mxu1 %v453_v12 }
  0xb7   :  { %796 = vmatpush3.msra.mxu0 %v629_v61  ;;  %827 = vmatpush3.msra.mxu1 %v453_v12 }
  0xb8   :  { %797 = vmatprep.subr.mxu0 %v628_v62 }
  0xb9   :  { %798 = vmatpush3.msra.mxu0 %v628_v62 }
  0xba   :  { %799 = vmatprep.subr.mxu0 %v627_v63 }
  0xbb   :  { %800 = vmatpush3.msra.mxu0 %v627_v63 }
  0xbc   :  { %801 = vmatprep.subr.mxu0 %v626_v0 }
  0xbd   :  { %802 = vmatpush3.msra.mxu0 %v626_v0 }
  0xbe   :  { %803 = vmatprep.subr.mxu0 %v625_v1 }
  0xbf   :  { %804 = vmatpush3.msra.mxu0 %v625_v1 }
  0xc0   :  { %805 = vmatprep.subr.mxu0 %v624_v2 }
  0xc1   :  { %806 = vmatpush3.msra.mxu0 %v624_v2 }
  0xc2   :  { %807 = vmatprep.subr.mxu0 %v623_v3 }
  0xc3   :  { %808 = vmatpush3.msra.mxu0 %v623_v3 }
  0xc4   :  { %809 = vmatprep.subr.mxu0 %v622_v4 }
  0xc5   :  { %810 = vmatpush3.msra.mxu0 %v622_v4 }
  0xc6   :  { %811 = vmatprep.subr.mxu0 %v621_v5 }
  0xc7   :  { %812 = vmatpush3.msra.mxu0 %v621_v5 }
  0xc8   :  { %813 = vmatprep.subr.mxu0 %v620_v6 }
  0xc9   :  { %814 = vmatpush3.msra.mxu0 %v620_v6 }
  0xca   :  { %815 = vmatprep.subr.mxu0 %v619_v7 }
  0xcb   :  { %816 = vmatpush3.msra.mxu0 %v619_v7 }
  0xcc   :  { %818 = vmatmul.mubr.msk.f32.vlgmr.msra.gmra.mxu0 %vm654_vm8, %v158_v8 }
 0x16c   :  { %v749_v13 = vpop.f32.mrf.mxu0 }
 0x16e   :  { %v264_v15 = vpop.f32.mrf.mxu0 }
 0x170   :  { %v784_v14 = vpop.f32.mrf.mxu1 }
 0x171   :  { %v345_v17 = vadd.f32 %v784_v14, %v749_v13 }
 0x172   :  { %v339_v16 = vpop.f32.mrf.mxu1 }
 0x173   :  { %v340_v19 = vadd.f32 %v339_v16, %v264_v15 }
 0x18c   :  { %v819_v18 = vpop.f32.mrf.mxu0 }
 0x18d   :  { %v441_v20 = vadd.f32 %v819_v18, %v345_v17 }
 0x18e   :  { %v431_v22 = vpop.f32.mrf.mxu0 }
 0x18f   :  { %v440_v23 = vadd.f32 %v431_v22, %v340_v19  ;;  %v450_v24 = vadd.f32 %v639_v21, %v441_v20 }
 0x191   :  { %v449_v25 = vadd.f32 %v639_v21, %v440_v23  ;;  %v452_v27 = vmax.f32 %v450_v24, 0.0 }
 0x193   :  { %v451_v26 = vmax.f32 %v449_v25, 0.0 }
 0x195   :  { %828 = vmatprep.mubr.msk.f32.mxu1 %vm464_vm9, %v451_v26 }
 0x196   :  { %829 = vmatmul.mubr.msk.f32.vlgmr.msra.gmra.mxu1 %vm464_vm9, %v452_v27 }
 0x256   :  { %v830_v29 = vpop.f32.mrf.mxu1 }
 0x257   :  { %v543_v30 = vadd.f32 %v830_v29, %v640_v28 }
 0x258   :  { %v537_v31 = vpop.f32.mrf.mxu1 }
 0x259   :  { %547 = vst [vmem:[#allocation6 + $0x8] sm:$0xff] %v543_v30  ;;  %v538_v32 = vadd.f32 %v640_v28, %v537_v31 }
 0x25b   :  { %546 = vst [vmem:[#allocation6] sm:$0xff] %v538_v32 }
 0x25c   :  { %873 = shalt.err (!%p870_p8)
}
 0x25d   :  { %s891_s23 = smov 128   ;;  %s892_s24 = smov 8  }
 0x25e   :  { %559 = dma.vmem_to_hbm [thread:$0]  %s554_s22, 256, %s1193_s8, [#allocation7], %s891_s23, %s891_s23, %s892_s24  }
 0x25f   :  { %884 = dma.done.wait [#allocation7], 256  }
 0x260   :  { %885 = vsyncadd [#allocation7], 4294967040 }
 0x261   :  { %563 = vsyncpa [#allocation7], 1 }

</bundles_post_ra>
